<compile_context>
chip_gen: v7x
topology: tpu7x:2x2x1
jax: 0.10.0
libtpu: 0.0.40
codegen_flags: <defaults>
</compile_context>

<pallas_src>
import jax
import jax.numpy as jnp
from jax.experimental import pallas as pl
from jax.experimental.pallas import tpu as pltpu

# ---- YOLO hyper-parameters (match the PyTorch module defaults) --------------
S = 7          # split size
B = 2          # boxes per cell
C = 20         # classes
FEAT = C + B * 5          # 30 channels per cell
LAMBDA_NOOBJ = 0.5
LAMBDA_COORD = 5.0
EPS = 1e-6


# ------------------------- transposed-layout helpers --------------------------
def _corners_area(box):
    """box: (4, L) rows = x, y, w, h (midpoint). Returns corner rows + area."""
    x1 = box[0:1, :] - box[2:3, :] * 0.5
    y1 = box[1:2, :] - box[3:4, :] * 0.5
    x2 = box[0:1, :] + box[2:3, :] * 0.5
    y2 = box[1:2, :] + box[3:4, :] * 0.5
    area = jnp.abs((x2 - x1) * (y2 - y1))
    return x1, y1, x2, y2, area


def _iou_terms(ca, cb):
    """Returns (intersection, denominator) with denominator > 0."""
    x1a, y1a, x2a, y2a, aa = ca
    x1b, y1b, x2b, y2b, ab = cb
    iw = jnp.maximum(jnp.minimum(x2a, x2b) - jnp.maximum(x1a, x1b), 0.0)
    ih = jnp.maximum(jnp.minimum(y2a, y2b) - jnp.maximum(y1a, y1b), 0.0)
    inter = iw * ih
    den = aa + ab - inter + EPS
    return inter, den


# ----------------------------- Pallas kernel ---------------------------------
def yolo_loss_kernel(pred_ref, tgt_ref, out_ref, acc_ref):
    step = pl.program_id(0)

    @pl.when(step == 0)
    def _init():
        acc_ref[0] = jnp.float32(0.0)

    pred = pred_ref[...].astype(jnp.float32)    # (FEAT, TR)  features x cells
    tgt = tgt_ref[...].astype(jnp.float32)      # (FEAT, TR)

    # Static sublane slices (lane axis = cells stays dense).
    b1 = pred[C + 1:C + 5, :]                   # (4, TR) box 1: x, y, w, h
    b2 = pred[C + 6:C + 10, :]                  # (4, TR) box 2
    tb = tgt[C + 1:C + 5, :]                    # (4, TR) target box

    exists = tgt[C:C + 1, :]                    # (1, TR) objectness gate (0/1)
    no_obj = 1.0 - exists

    # ---- best-box selection (target corners/area computed once) ----
    ct = _corners_area(tb)
    inter1, den1 = _iou_terms(_corners_area(b1), ct)
    inter2, den2 = _iou_terms(_corners_area(b2), ct)
    # iou2 > iou1  <=>  inter2*den1 > inter1*den2  (den* > 0).  Strict '>'
    # keeps torch.max's first-index convention: box 1 wins ties (incl. 0/0).
    best2 = jnp.where(inter2 * den1 > inter1 * den2, 1.0, 0.0)   # (1, TR)
    best1 = 1.0 - best2

    # ---- coordinate loss (lambda_coord) ----
    sel = best2 * b2 + best1 * b1               # (4, TR)
    box_pred = exists * sel
    box_tgt = exists * tb
    xy_d = box_pred[0:2, :] - box_tgt[0:2, :]
    wh_p = box_pred[2:4, :]
    wh_sqrt = jnp.sqrt(jnp.abs(wh_p + EPS))
    # torch.sign semantics: sign(0) == 0, so empty / zero-padded cells add 0.
    wh_pred = jnp.where(wh_p > 0.0, wh_sqrt,
                        jnp.where(wh_p < 0.0, -wh_sqrt, 0.0))
    wh_d = wh_pred - jnp.sqrt(box_tgt[2:4, :])

    # ---- object / no-object losses ----
    # exists / no_obj are 0-1 gates, so a*(x - y) == a*x - a*y exactly.
    conf_sel = best2 * pred[C + 5:C + 6, :] + best1 * pred[C:C + 1, :]
    obj_d = exists * (conf_sel - exists)
    noobj_d1 = no_obj * (pred[C:C + 1, :] - exists)
    noobj_d2 = no_obj * (pred[C + 5:C + 6, :] - exists)

    # ---- class loss ----
    cls_d = exists * (pred[:C, :] - tgt[:C, :])

    # ---- single fused reduction: one per-lane accumulator, one final sum ----
    per_lane = (
        LAMBDA_COORD * (jnp.sum(xy_d * xy_d, axis=0, keepdims=True)
                        + jnp.sum(wh_d * wh_d, axis=0, keepdims=True))
        + obj_d * obj_d
        + LAMBDA_NOOBJ * (noobj_d1 * noobj_d1 + noobj_d2 * noobj_d2)
        + jnp.sum(cls_d * cls_d, axis=0, keepdims=True)
    )                                           # (1, TR)
    acc_ref[0] = acc_ref[0] + jnp.sum(per_lane)

    @pl.when(step == pl.num_programs(0) - 1)
    def _finalize():
        out_ref[0, 0] = acc_ref[0]


def yolo_loss_pallas(predictions, target, *, lane_tile=2048):
    """predictions: any shape reshapable to (-1, S, S, FEAT); target: (N, S, S, FEAT)."""
    pred2d = jnp.reshape(predictions, (-1, FEAT))     # keep caller dtype
    tgt2d = jnp.reshape(target, (-1, FEAT))
    rows = pred2d.shape[0]

    # Lane-dense layout: cells on the 128-lane axis, features on sublanes.
    pred_t = pred2d.T                                  # (FEAT, rows)
    tgt_t = tgt2d.T

    rows_pad = -(-rows // 128) * 128
    tr = min(lane_tile, rows_pad)                      # lane tile, mult. of 128
    rows_pad = -(-rows_pad // tr) * tr
    if rows_pad != rows:
        pad = ((0, 0), (0, rows_pad - rows))           # zero pad -> 0 loss
        pred_t = jnp.pad(pred_t, pad)
        tgt_t = jnp.pad(tgt_t, pad)
    num_tiles = rows_pad // tr

    bytes_in = (pred_t.size * pred_t.dtype.itemsize
                + tgt_t.size * tgt_t.dtype.itemsize)
    cost = pl.CostEstimate(flops=200 * rows,
                           transcendentals=4 * rows,
                           bytes_accessed=int(bytes_in) + 4)

    out = pl.pallas_call(
        yolo_loss_kernel,
        out_shape=jax.ShapeDtypeStruct((1, 1), jnp.float32),
        grid_spec=pltpu.PrefetchScalarGridSpec(
            num_scalar_prefetch=0,
            grid=(num_tiles,),
            in_specs=[
                pl.BlockSpec((FEAT, tr), lambda i: (0, i)),
                pl.BlockSpec((FEAT, tr), lambda i: (0, i)),
            ],
            out_specs=pl.BlockSpec(memory_space=pltpu.SMEM),
            scratch_shapes=[pltpu.SMEM((1,), jnp.float32)],
        ),
        compiler_params=pltpu.CompilerParams(
            dimension_semantics=("arbitrary",)),
        cost_estimate=cost,
    )(pred_t, tgt_t)
    return out[0, 0]


# --------------------------- pure-JAX reference -------------------------------
def _iou_midpoint(box1, box2):
    b1x1 = box1[..., 0:1] - box1[..., 2:3] / 2
    b1y1 = box1[..., 1:2] - box1[..., 3:4] / 2
    b1x2 = box1[..., 0:1] + box1[..., 2:3] / 2
    b1y2 = box1[..., 1:2] + box1[..., 3:4] / 2
    b2x1 = box2[..., 0:1] - box2[..., 2:3] / 2
    b2y1 = box2[..., 1:2] - box2[..., 3:4] / 2
    b2x2 = box2[..., 0:1] + box2[..., 2:3] / 2
    b2y2 = box2[..., 1:2] + box2[..., 3:4] / 2

    x1 = jnp.maximum(b1x1, b2x1)
    y1 = jnp.maximum(b1y1, b2y1)
    x2 = jnp.minimum(b1x2, b2x2)
    y2 = jnp.minimum(b1y2, b2y2)

    inter = jnp.maximum(x2 - x1, 0.0) * jnp.maximum(y2 - y1, 0.0)
    area1 = jnp.abs((b1x2 - b1x1) * (b1y2 - b1y1))
    area2 = jnp.abs((b2x2 - b2x1) * (b2y2 - b2y1))
    return inter / (area1 + area2 - inter + EPS)


def _sign(x):
    return jnp.where(x > 0, 1.0, jnp.where(x < 0, -1.0, 0.0))


def yolo_loss_ref(predictions, target):
    pred = jnp.reshape(predictions, (-1, FEAT)).astype(jnp.float32)
    tgt = jnp.reshape(target, (-1, FEAT)).astype(jnp.float32)

    bboxes1 = pred[:, C + 1:C + 5]
    bboxes2 = pred[:, C + 6:C + 10]
    tbox = tgt[:, C + 1:C + 5]

    iou_b1 = _iou_midpoint(bboxes1, tbox)
    iou_b2 = _iou_midpoint(bboxes2, tbox)
    bestbox = jnp.where(iou_b2 > iou_b1, 1.0, 0.0)

    exists = tgt[:, C:C + 1]

    box_pred = exists * (bestbox * bboxes2 + (1.0 - bestbox) * bboxes1)
    box_tgt = exists * tbox
    xy_pred = box_pred[:, 0:2]
    wh_pred = _sign(box_pred[:, 2:4]) * jnp.sqrt(jnp.abs(box_pred[:, 2:4] + EPS))
    xy_tgt = box_tgt[:, 0:2]
    wh_tgt = jnp.sqrt(box_tgt[:, 2:4])
    box_loss = jnp.sum((xy_pred - xy_tgt) ** 2) + jnp.sum((wh_pred - wh_tgt) ** 2)

    pred_box = bestbox * pred[:, C + 5:C + 6] + (1.0 - bestbox) * pred[:, C:C + 1]
    object_loss = jnp.sum((exists * pred_box - exists * tgt[:, C:C + 1]) ** 2)

    no_obj = 1.0 - exists
    no_object_loss = jnp.sum((no_obj * pred[:, C:C + 1] - no_obj * tgt[:, C:C + 1]) ** 2)
    no_object_loss += jnp.sum((no_obj * pred[:, C + 5:C + 6] - no_obj * tgt[:, C:C + 1]) ** 2)

    class_loss = jnp.sum((exists * pred[:, :C] - exists * tgt[:, :C]) ** 2)

    return (LAMBDA_COORD * box_loss + object_loss
            + LAMBDA_NOOBJ * no_object_loss + class_loss)


if __name__ == "__main__":
    key = jax.random.PRNGKey(0)
    k1, k2, k3 = jax.random.split(key, 3)

    N = 2
    # Raw network output (flat, like the YOLOv1 head), reshaped inside.
    predictions = jax.random.normal(k1, (N, S * S * FEAT), dtype=jnp.float32)
    # Target: classes in [0,1), binary objectness at index C, boxes in [0,1).
    target = jax.random.uniform(k2, (N, S, S, FEAT), dtype=jnp.float32)
    obj = (jax.random.uniform(k3, (N, S, S)) > 0.5).astype(jnp.float32)
    target = target.at[..., C].set(obj)

    loss = jax.block_until_ready(yolo_loss_pallas(predictions, target))
    ref = jax.block_until_ready(yolo_loss_ref(predictions, target))

    assert jnp.isfinite(loss), "loss is not finite"
    assert jnp.allclose(loss, ref, rtol=1e-4, atol=1e-4), (loss, ref)
    print("KERNEL_OK")
</pallas_src>

<mosaic_0001>
module attributes {stable_mosaic.version = 11 : i64} {
  func.func @yolo_loss_kernel(%arg0: i32, %arg1: memref<30x128xf32, #tpu.memory_space<vmem>>, %arg2: memref<30x128xf32, #tpu.memory_space<vmem>>, %arg3: memref<1x1xf32, #tpu.memory_space<smem>>, %arg4: memref<1xf32, #tpu.memory_space<smem>>) attributes {dimension_semantics = [#tpu.dimension_semantics<arbitrary>], iteration_bounds = array<i64: 1>, scalar_prefetch = 0 : i64, scratch_operands = 1 : i64, tpu.core_type = #tpu.core_type<tc>, window_params = [{transform_indices = @transform_0, window_bounds = array<i64: 30, 128>}, {transform_indices = @transform_1, window_bounds = array<i64: 30, 128>}, {transform_indices = @transform_2, window_bounds = array<i64: 1, 1>}]} {
    %c0_i32 = arith.constant 0 : i32
    %0 = arith.cmpi eq, %arg0, %c0_i32 : i32
    %1 = arith.extui %0 : i1 to i32
    %c0_i32_0 = arith.constant 0 : i32
    %2 = arith.cmpi ne, %1, %c0_i32_0 : i32
    scf.if %2 {
      %cst_40 = arith.constant 0.000000e+00 : f32
      %c0_41 = arith.constant 0 : index
      %199 = memref.load %arg4[%c0_41] : memref<1xf32, #tpu.memory_space<smem>>
      memref.store %cst_40, %arg4[%c0_41] : memref<1xf32, #tpu.memory_space<smem>>
    } else {
    }
    %c0 = arith.constant 0 : index
    %c0_1 = arith.constant 0 : index
    %3 = vector.load %arg1[%c0, %c0_1] : memref<30x128xf32, #tpu.memory_space<vmem>>, vector<30x128xf32>
    %c0_2 = arith.constant 0 : index
    %c0_3 = arith.constant 0 : index
    %4 = vector.load %arg2[%c0_2, %c0_3] : memref<30x128xf32, #tpu.memory_space<vmem>>, vector<30x128xf32>
    %5 = vector.extract_strided_slice %3 {offsets = [21, 0], sizes = [4, 128], strides = [1, 1]} : vector<30x128xf32> to vector<4x128xf32>
    %6 = vector.extract_strided_slice %3 {offsets = [26, 0], sizes = [4, 128], strides = [1, 1]} : vector<30x128xf32> to vector<4x128xf32>
    %7 = vector.extract_strided_slice %4 {offsets = [21, 0], sizes = [4, 128], strides = [1, 1]} : vector<30x128xf32> to vector<4x128xf32>
    %8 = vector.extract_strided_slice %4 {offsets = [20, 0], sizes = [1, 128], strides = [1, 1]} : vector<30x128xf32> to vector<1x128xf32>
    %cst = arith.constant 1.000000e+00 : f32
    %9 = vector.broadcast %cst : f32 to vector<1x128xf32>
    %10 = arith.subf %9, %8 : vector<1x128xf32>
    %11 = vector.extract_strided_slice %7 {offsets = [0, 0], sizes = [1, 128], strides = [1, 1]} : vector<4x128xf32> to vector<1x128xf32>
    %12 = vector.extract_strided_slice %7 {offsets = [2, 0], sizes = [1, 128], strides = [1, 1]} : vector<4x128xf32> to vector<1x128xf32>
    %cst_4 = arith.constant 5.000000e-01 : f32
    %13 = vector.broadcast %cst_4 : f32 to vector<1x128xf32>
    %14 = arith.mulf %12, %13 : vector<1x128xf32>
    %15 = arith.subf %11, %14 : vector<1x128xf32>
    %16 = vector.extract_strided_slice %7 {offsets = [1, 0], sizes = [1, 128], strides = [1, 1]} : vector<4x128xf32> to vector<1x128xf32>
    %17 = vector.extract_strided_slice %7 {offsets = [3, 0], sizes = [1, 128], strides = [1, 1]} : vector<4x128xf32> to vector<1x128xf32>
    %cst_5 = arith.constant 5.000000e-01 : f32
    %18 = vector.broadcast %cst_5 : f32 to vector<1x128xf32>
    %19 = arith.mulf %17, %18 : vector<1x128xf32>
    %20 = arith.subf %16, %19 : vector<1x128xf32>
    %21 = vector.extract_strided_slice %7 {offsets = [0, 0], sizes = [1, 128], strides = [1, 1]} : vector<4x128xf32> to vector<1x128xf32>
    %22 = vector.extract_strided_slice %7 {offsets = [2, 0], sizes = [1, 128], strides = [1, 1]} : vector<4x128xf32> to vector<1x128xf32>
    %cst_6 = arith.constant 5.000000e-01 : f32
    %23 = vector.broadcast %cst_6 : f32 to vector<1x128xf32>
    %24 = arith.mulf %22, %23 : vector<1x128xf32>
    %25 = arith.addf %21, %24 : vector<1x128xf32>
    %26 = vector.extract_strided_slice %7 {offsets = [1, 0], sizes = [1, 128], strides = [1, 1]} : vector<4x128xf32> to vector<1x128xf32>
    %27 = vector.extract_strided_slice %7 {offsets = [3, 0], sizes = [1, 128], strides = [1, 1]} : vector<4x128xf32> to vector<1x128xf32>
    %cst_7 = arith.constant 5.000000e-01 : f32
    %28 = vector.broadcast %cst_7 : f32 to vector<1x128xf32>
    %29 = arith.mulf %27, %28 : vector<1x128xf32>
    %30 = arith.addf %26, %29 : vector<1x128xf32>
    %31 = arith.subf %25, %15 : vector<1x128xf32>
    %32 = arith.subf %30, %20 : vector<1x128xf32>
    %33 = arith.mulf %31, %32 : vector<1x128xf32>
    %34 = math.absf %33 : vector<1x128xf32>
    %35 = vector.extract_strided_slice %5 {offsets = [0, 0], sizes = [1, 128], strides = [1, 1]} : vector<4x128xf32> to vector<1x128xf32>
    %36 = vector.extract_strided_slice %5 {offsets = [2, 0], sizes = [1, 128], strides = [1, 1]} : vector<4x128xf32> to vector<1x128xf32>
    %cst_8 = arith.constant 5.000000e-01 : f32
    %37 = vector.broadcast %cst_8 : f32 to vector<1x128xf32>
    %38 = arith.mulf %36, %37 : vector<1x128xf32>
    %39 = arith.subf %35, %38 : vector<1x128xf32>
    %40 = vector.extract_strided_slice %5 {offsets = [1, 0], sizes = [1, 128], strides = [1, 1]} : vector<4x128xf32> to vector<1x128xf32>
    %41 = vector.extract_strided_slice %5 {offsets = [3, 0], sizes = [1, 128], strides = [1, 1]} : vector<4x128xf32> to vector<1x128xf32>
    %cst_9 = arith.constant 5.000000e-01 : f32
    %42 = vector.broadcast %cst_9 : f32 to vector<1x128xf32>
    %43 = arith.mulf %41, %42 : vector<1x128xf32>
    %44 = arith.subf %40, %43 : vector<1x128xf32>
    %45 = vector.extract_strided_slice %5 {offsets = [0, 0], sizes = [1, 128], strides = [1, 1]} : vector<4x128xf32> to vector<1x128xf32>
    %46 = vector.extract_strided_slice %5 {offsets = [2, 0], sizes = [1, 128], strides = [1, 1]} : vector<4x128xf32> to vector<1x128xf32>
    %cst_10 = arith.constant 5.000000e-01 : f32
    %47 = vector.broadcast %cst_10 : f32 to vector<1x128xf32>
    %48 = arith.mulf %46, %47 : vector<1x128xf32>
    %49 = arith.addf %45, %48 : vector<1x128xf32>
    %50 = vector.extract_strided_slice %5 {offsets = [1, 0], sizes = [1, 128], strides = [1, 1]} : vector<4x128xf32> to vector<1x128xf32>
    %51 = vector.extract_strided_slice %5 {offsets = [3, 0], sizes = [1, 128], strides = [1, 1]} : vector<4x128xf32> to vector<1x128xf32>
    %cst_11 = arith.constant 5.000000e-01 : f32
    %52 = vector.broadcast %cst_11 : f32 to vector<1x128xf32>
    %53 = arith.mulf %51, %52 : vector<1x128xf32>
    %54 = arith.addf %50, %53 : vector<1x128xf32>
    %55 = arith.subf %49, %39 : vector<1x128xf32>
    %56 = arith.subf %54, %44 : vector<1x128xf32>
    %57 = arith.mulf %55, %56 : vector<1x128xf32>
    %58 = math.absf %57 : vector<1x128xf32>
    %59 = arith.minimumf %49, %25 : vector<1x128xf32>
    %60 = arith.maximumf %39, %15 : vector<1x128xf32>
    %61 = arith.subf %59, %60 : vector<1x128xf32>
    %cst_12 = arith.constant 0.000000e+00 : f32
    %62 = vector.broadcast %cst_12 : f32 to vector<1x128xf32>
    %63 = arith.maximumf %61, %62 : vector<1x128xf32>
    %64 = arith.minimumf %54, %30 : vector<1x128xf32>
    %65 = arith.maximumf %44, %20 : vector<1x128xf32>
    %66 = arith.subf %64, %65 : vector<1x128xf32>
    %cst_13 = arith.constant 0.000000e+00 : f32
    %67 = vector.broadcast %cst_13 : f32 to vector<1x128xf32>
    %68 = arith.maximumf %66, %67 : vector<1x128xf32>
    %69 = arith.mulf %63, %68 : vector<1x128xf32>
    %70 = arith.addf %58, %34 : vector<1x128xf32>
    %71 = arith.subf %70, %69 : vector<1x128xf32>
    %cst_14 = arith.constant 9.99999997E-7 : f32
    %72 = vector.broadcast %cst_14 : f32 to vector<1x128xf32>
    %73 = arith.addf %71, %72 : vector<1x128xf32>
    %74 = vector.extract_strided_slice %6 {offsets = [0, 0], sizes = [1, 128], strides = [1, 1]} : vector<4x128xf32> to vector<1x128xf32>
    %75 = vector.extract_strided_slice %6 {offsets = [2, 0], sizes = [1, 128], strides = [1, 1]} : vector<4x128xf32> to vector<1x128xf32>
    %cst_15 = arith.constant 5.000000e-01 : f32
    %76 = vector.broadcast %cst_15 : f32 to vector<1x128xf32>
    %77 = arith.mulf %75, %76 : vector<1x128xf32>
    %78 = arith.subf %74, %77 : vector<1x128xf32>
    %79 = vector.extract_strided_slice %6 {offsets = [1, 0], sizes = [1, 128], strides = [1, 1]} : vector<4x128xf32> to vector<1x128xf32>
    %80 = vector.extract_strided_slice %6 {offsets = [3, 0], sizes = [1, 128], strides = [1, 1]} : vector<4x128xf32> to vector<1x128xf32>
    %cst_16 = arith.constant 5.000000e-01 : f32
    %81 = vector.broadcast %cst_16 : f32 to vector<1x128xf32>
    %82 = arith.mulf %80, %81 : vector<1x128xf32>
    %83 = arith.subf %79, %82 : vector<1x128xf32>
    %84 = vector.extract_strided_slice %6 {offsets = [0, 0], sizes = [1, 128], strides = [1, 1]} : vector<4x128xf32> to vector<1x128xf32>
    %85 = vector.extract_strided_slice %6 {offsets = [2, 0], sizes = [1, 128], strides = [1, 1]} : vector<4x128xf32> to vector<1x128xf32>
    %cst_17 = arith.constant 5.000000e-01 : f32
    %86 = vector.broadcast %cst_17 : f32 to vector<1x128xf32>
    %87 = arith.mulf %85, %86 : vector<1x128xf32>
    %88 = arith.addf %84, %87 : vector<1x128xf32>
    %89 = vector.extract_strided_slice %6 {offsets = [1, 0], sizes = [1, 128], strides = [1, 1]} : vector<4x128xf32> to vector<1x128xf32>
    %90 = vector.extract_strided_slice %6 {offsets = [3, 0], sizes = [1, 128], strides = [1, 1]} : vector<4x128xf32> to vector<1x128xf32>
    %cst_18 = arith.constant 5.000000e-01 : f32
    %91 = vector.broadcast %cst_18 : f32 to vector<1x128xf32>
    %92 = arith.mulf %90, %91 : vector<1x128xf32>
    %93 = arith.addf %89, %92 : vector<1x128xf32>
    %94 = arith.subf %88, %78 : vector<1x128xf32>
    %95 = arith.subf %93, %83 : vector<1x128xf32>
    %96 = arith.mulf %94, %95 : vector<1x128xf32>
    %97 = math.absf %96 : vector<1x128xf32>
    %98 = arith.minimumf %88, %25 : vector<1x128xf32>
    %99 = arith.maximumf %78, %15 : vector<1x128xf32>
    %100 = arith.subf %98, %99 : vector<1x128xf32>
    %cst_19 = arith.constant 0.000000e+00 : f32
    %101 = vector.broadcast %cst_19 : f32 to vector<1x128xf32>
    %102 = arith.maximumf %100, %101 : vector<1x128xf32>
    %103 = arith.minimumf %93, %30 : vector<1x128xf32>
    %104 = arith.maximumf %83, %20 : vector<1x128xf32>
    %105 = arith.subf %103, %104 : vector<1x128xf32>
    %cst_20 = arith.constant 0.000000e+00 : f32
    %106 = vector.broadcast %cst_20 : f32 to vector<1x128xf32>
    %107 = arith.maximumf %105, %106 : vector<1x128xf32>
    %108 = arith.mulf %102, %107 : vector<1x128xf32>
    %109 = arith.addf %97, %34 : vector<1x128xf32>
    %110 = arith.subf %109, %108 : vector<1x128xf32>
    %cst_21 = arith.constant 9.99999997E-7 : f32
    %111 = vector.broadcast %cst_21 : f32 to vector<1x128xf32>
    %112 = arith.addf %110, %111 : vector<1x128xf32>
    %113 = arith.mulf %108, %73 : vector<1x128xf32>
    %114 = arith.mulf %69, %112 : vector<1x128xf32>
    %115 = arith.cmpf ogt, %113, %114 : vector<1x128xf32>
    %cst_22 = arith.constant 1.000000e+00 : f32
    %cst_23 = arith.constant 0.000000e+00 : f32
    %116 = vector.broadcast %cst_22 : f32 to vector<1x128xf32>
    %117 = vector.broadcast %cst_23 : f32 to vector<1x128xf32>
    %118 = arith.select %115, %116, %117 : vector<1x128xi1>, vector<1x128xf32>
    %cst_24 = arith.constant 1.000000e+00 : f32
    %119 = vector.broadcast %cst_24 : f32 to vector<1x128xf32>
    %120 = arith.subf %119, %118 : vector<1x128xf32>
    %121 = vector.broadcast %118 : vector<1x128xf32> to vector<4x128xf32>
    %122 = arith.mulf %121, %6 : vector<4x128xf32>
    %123 = vector.broadcast %120 : vector<1x128xf32> to vector<4x128xf32>
    %124 = arith.mulf %123, %5 : vector<4x128xf32>
    %125 = arith.addf %122, %124 : vector<4x128xf32>
    %126 = vector.broadcast %8 : vector<1x128xf32> to vector<4x128xf32>
    %127 = arith.mulf %126, %125 : vector<4x128xf32>
    %128 = vector.broadcast %8 : vector<1x128xf32> to vector<4x128xf32>
    %129 = arith.mulf %128, %7 : vector<4x128xf32>
    %130 = vector.extract_strided_slice %127 {offsets = [0, 0], sizes = [2, 128], strides = [1, 1]} : vector<4x128xf32> to vector<2x128xf32>
    %131 = vector.extract_strided_slice %129 {offsets = [0, 0], sizes = [2, 128], strides = [1, 1]} : vector<4x128xf32> to vector<2x128xf32>
    %132 = arith.subf %130, %131 : vector<2x128xf32>
    %133 = vector.extract_strided_slice %127 {offsets = [2, 0], sizes = [2, 128], strides = [1, 1]} : vector<4x128xf32> to vector<2x128xf32>
    %cst_25 = arith.constant 9.99999997E-7 : f32
    %134 = vector.broadcast %cst_25 : f32 to vector<2x128xf32>
    %135 = arith.addf %133, %134 : vector<2x128xf32>
    %136 = math.absf %135 : vector<2x128xf32>
    %137 = math.sqrt %136 : vector<2x128xf32>
    %cst_26 = arith.constant 0.000000e+00 : f32
    %138 = vector.broadcast %cst_26 : f32 to vector<2x128xf32>
    %139 = arith.cmpf ogt, %133, %138 : vector<2x128xf32>
    %cst_27 = arith.constant 0.000000e+00 : f32
    %140 = vector.broadcast %cst_27 : f32 to vector<2x128xf32>
    %141 = arith.cmpf olt, %133, %140 : vector<2x128xf32>
    %cst_28 = arith.constant 0.000000e+00 : f32
    %142 = vector.broadcast %cst_28 : f32 to vector<2x128xf32>
    %143 = arith.subf %142, %137 : vector<2x128xf32>
    %cst_29 = arith.constant 0.000000e+00 : f32
    %144 = vector.broadcast %cst_29 : f32 to vector<2x128xf32>
    %145 = arith.select %141, %143, %144 : vector<2x128xi1>, vector<2x128xf32>
    %146 = arith.select %139, %137, %145 : vector<2x128xi1>, vector<2x128xf32>
    %147 = vector.extract_strided_slice %129 {offsets = [2, 0], sizes = [2, 128], strides = [1, 1]} : vector<4x128xf32> to vector<2x128xf32>
    %148 = math.sqrt %147 : vector<2x128xf32>
    %149 = arith.subf %146, %148 : vector<2x128xf32>
    %150 = vector.extract_strided_slice %3 {offsets = [25, 0], sizes = [1, 128], strides = [1, 1]} : vector<30x128xf32> to vector<1x128xf32>
    %151 = arith.mulf %118, %150 : vector<1x128xf32>
    %152 = vector.extract_strided_slice %3 {offsets = [20, 0], sizes = [1, 128], strides = [1, 1]} : vector<30x128xf32> to vector<1x128xf32>
    %153 = arith.mulf %120, %152 : vector<1x128xf32>
    %154 = arith.addf %151, %153 : vector<1x128xf32>
    %155 = arith.subf %154, %8 : vector<1x128xf32>
    %156 = arith.mulf %8, %155 : vector<1x128xf32>
    %157 = vector.extract_strided_slice %3 {offsets = [20, 0], sizes = [1, 128], strides = [1, 1]} : vector<30x128xf32> to vector<1x128xf32>
    %158 = arith.subf %157, %8 : vector<1x128xf32>
    %159 = arith.mulf %10, %158 : vector<1x128xf32>
    %160 = vector.extract_strided_slice %3 {offsets = [25, 0], sizes = [1, 128], strides = [1, 1]} : vector<30x128xf32> to vector<1x128xf32>
    %161 = arith.subf %160, %8 : vector<1x128xf32>
    %162 = arith.mulf %10, %161 : vector<1x128xf32>
    %163 = vector.extract_strided_slice %3 {offsets = [0, 0], sizes = [20, 128], strides = [1, 1]} : vector<30x128xf32> to vector<20x128xf32>
    %164 = vector.extract_strided_slice %4 {offsets = [0, 0], sizes = [20, 128], strides = [1, 1]} : vector<30x128xf32> to vector<20x128xf32>
    %165 = arith.subf %163, %164 : vector<20x128xf32>
    %166 = vector.broadcast %8 : vector<1x128xf32> to vector<20x128xf32>
    %167 = arith.mulf %166, %165 : vector<20x128xf32>
    %168 = arith.mulf %132, %132 : vector<2x128xf32>
    %cst_30 = arith.constant dense<0.000000e+00> : vector<128xf32>
    %169 = vector.multi_reduction <add>, %168, %cst_30 [0] : vector<2x128xf32> to vector<128xf32>
    %170 = vector.shape_cast %169 : vector<128xf32> to vector<1x128xf32>
    %171 = arith.mulf %149, %149 : vector<2x128xf32>
    %cst_31 = arith.constant dense<0.000000e+00> : vector<128xf32>
    %172 = vector.multi_reduction <add>, %171, %cst_31 [0] : vector<2x128xf32> to vector<128xf32>
    %173 = vector.shape_cast %172 : vector<128xf32> to vector<1x128xf32>
    %174 = arith.addf %170, %173 : vector<1x128xf32>
    %cst_32 = arith.constant 5.000000e+00 : f32
    %175 = vector.broadcast %cst_32 : f32 to vector<1x128xf32>
    %176 = arith.mulf %175, %174 : vector<1x128xf32>
    %177 = arith.mulf %156, %156 : vector<1x128xf32>
    %178 = arith.addf %176, %177 : vector<1x128xf32>
    %179 = arith.mulf %159, %159 : vector<1x128xf32>
    %180 = arith.mulf %162, %162 : vector<1x128xf32>
    %181 = arith.addf %179, %180 : vector<1x128xf32>
    %cst_33 = arith.constant 5.000000e-01 : f32
    %182 = vector.broadcast %cst_33 : f32 to vector<1x128xf32>
    %183 = arith.mulf %182, %181 : vector<1x128xf32>
    %184 = arith.addf %178, %183 : vector<1x128xf32>
    %185 = arith.mulf %167, %167 : vector<20x128xf32>
    %cst_34 = arith.constant dense<0.000000e+00> : vector<128xf32>
    %186 = vector.multi_reduction <add>, %185, %cst_34 [0] : vector<20x128xf32> to vector<128xf32>
    %187 = vector.shape_cast %186 : vector<128xf32> to vector<1x128xf32>
    %188 = arith.addf %184, %187 : vector<1x128xf32>
    %c0_35 = arith.constant 0 : index
    %189 = memref.load %arg4[%c0_35] : memref<1xf32, #tpu.memory_space<smem>>
    %190 = vector.shape_cast %188 : vector<1x128xf32> to vector<1x1x128xf32>
    %cst_36 = arith.constant dense<0.000000e+00> : vector<1xf32>
    %191 = vector.multi_reduction <add>, %190, %cst_36 [1, 2] : vector<1x1x128xf32> to vector<1xf32>
    %192 = vector.shape_cast %191 : vector<1xf32> to vector<1x1x1xf32>
    %193 = vector.extract %192[0, 0, 0] : f32 from vector<1x1x1xf32>
    %194 = arith.addf %189, %193 : f32
    %c0_37 = arith.constant 0 : index
    %195 = memref.load %arg4[%c0_37] : memref<1xf32, #tpu.memory_space<smem>>
    memref.store %194, %arg4[%c0_37] : memref<1xf32, #tpu.memory_space<smem>>
    %c0_i32_38 = arith.constant 0 : i32
    %196 = arith.cmpi eq, %arg0, %c0_i32_38 : i32
    %197 = arith.extui %196 : i1 to i32
    %c0_i32_39 = arith.constant 0 : i32
    %198 = arith.cmpi ne, %197, %c0_i32_39 : i32
    scf.if %198 {
      %c0_40 = arith.constant 0 : index
      %199 = memref.load %arg4[%c0_40] : memref<1xf32, #tpu.memory_space<smem>>
      %c0_41 = arith.constant 0 : index
      %c0_42 = arith.constant 0 : index
      %200 = memref.load %arg3[%c0_41, %c0_42] : memref<1x1xf32, #tpu.memory_space<smem>>
      memref.store %199, %arg3[%c0_41, %c0_42] : memref<1x1xf32, #tpu.memory_space<smem>>
    } else {
    }
    return
  }
  func.func @transform_0(%arg0: i32) -> (i32, i32) {
    %c0_i32 = arith.constant 0 : i32
    %c0_i32_0 = arith.constant 0 : i32
    return %c0_i32, %arg0 : i32, i32
  }
  func.func @transform_1(%arg0: i32) -> (i32, i32) {
    %c0_i32 = arith.constant 0 : i32
    %c0_i32_0 = arith.constant 0 : i32
    return %c0_i32, %arg0 : i32, i32
  }
  func.func @transform_2(%arg0: i32) -> (i32, i32) {
    %c0_i32 = arith.constant 0 : i32
    %c0_i32_0 = arith.constant 0 : i32
    %c0_i32_1 = arith.constant 0 : i32
    return %c0_i32, %c0_i32_0 : i32, i32
  }
}

</mosaic_0001>

<bundles_post_ra>
// kernel: tpu_custom_call.1
= control target key start
LH: loop header
LB: loop body
LE: loop exit
PB: predicated region body
PF: predicated region fallthrough
CT: control target
= control target key end

     0   :  { %7 = vsyncpa [#allocation4], 0  ;;  %s524_s0 = inlined_call_operand.hbm [shape: f32[30,128], index: 0, kind: input, shape index: {}]   ;;  %s525_s1 = inlined_call_operand.hbm [shape: f32[30,128], index: 1, kind: input, shape index: {}]   ;;  %s526_s2 = inlined_call_operand.hbm [shape: f32[1,1], index: 2, kind: output, shape index: {}]  }
   0x1   :  { %8 = vsyncpa [#allocation7], 0 }
   0x2   :  { %9 = vsyncpa [#allocation5], 0  ;;  %s415_s9 = smov [#allocation3]   ;;  %s355_s13 = scalar_lea.hbm %s524_s0, 512 }
   0x3   :  { %s15_s10 = sshll.u32 %s415_s9, 4  ;;  %p356_p0 = scmp.ne.s32.totalorder %s524_s0, %s355_s13  ;;  %s16_s10 = int_to_ptr.vmem [resolvable:$true] %s15_s10 }
   0x4   :  { %p359_p1 = scmp.lt.u32.totalorder %s355_s13, %s524_s0 }
   0x6   :  { %p361_p2 = pnand %p359_p1, %p356_p0 }
   0x8   :  { %364 = shalt.err (!%p361_p2)
}
   0x9   :  { %s365_s18 = scalar_lea.vmem %s16_s10, 512  ;;  %p370_p4 = scmp.lt.s32.totalorder %s16_s10, %s16_s10 }
   0xa   :  { %p366_p3 = scmp.ne.s32.totalorder %s16_s10, %s365_s18  ;;  %p371_p5 = scmp.lt.s32.totalorder %s365_s18, %s365_s18 }
   0xc   :  { %p372_p6 = por %p371_p5, %p370_p4 }
   0xe   :  { %p373_p7 = pnand %p372_p6, %p366_p3 }
  0x10   :  { %376 = shalt.err (!%p373_p7)
}
  0x11   :  { %s416_s19 = smov 128   ;;  %s417_s20 = smov 8  }
  0x12   :  { %21 = dma.hbm_to_vmem [thread:$0]  %s524_s0, 512, %s16_s10, [#allocation4], %s416_s19, %s416_s19, %s417_s20  }
  0x13   :  { %s418_s23 = smov [#allocation6]   ;;  %s377_s27 = scalar_lea.hbm %s525_s1, 512 }
  0x14   :  { %s27_s24 = sshll.u32 %s418_s23, 4  ;;  %p378_p8 = scmp.ne.s32.totalorder %s525_s1, %s377_s27  ;;  %s28_s24 = int_to_ptr.vmem [resolvable:$true] %s27_s24 }
  0x15   :  { %p381_p9 = scmp.lt.u32.totalorder %s377_s27, %s525_s1 }
  0x17   :  { %p383_p10 = pnand %p381_p9, %p378_p8 }
  0x19   :  { %386 = shalt.err (!%p383_p10)
}
  0x1a   :  { %s387_s4 = scalar_lea.vmem %s28_s24, 512  ;;  %p392_p12 = scmp.lt.s32.totalorder %s28_s24, %s28_s24 }
  0x1b   :  { %p388_p11 = scmp.ne.s32.totalorder %s28_s24, %s387_s4  ;;  %p393_p13 = scmp.lt.s32.totalorder %s387_s4, %s387_s4 }
  0x1d   :  { %p394_p0 = por %p393_p13, %p392_p12 }
  0x1f   :  { %p395_p1 = pnand %p394_p0, %p388_p11 }
  0x21   :  { %398 = shalt.err (!%p395_p1)
}
  0x22   :  { %33 = dma.hbm_to_vmem [thread:$0]  %s525_s1, 512, %s28_s24, [#allocation7], %s416_s19, %s416_s19, %s417_s20  }
  0x23   :  { %409 = dma.done.wait [#allocation4], 512  }
  0x24   :  { %410 = vsyncadd [#allocation4], 4294966784 }
  0x25   :  { %411 = dma.done.wait [#allocation7], 512  }
  0x26   :  { %412 = vsyncadd [#allocation7], 4294966784  ;;  %v460_v0 = vld [vmem:[#allocation3 + $0x10] sm:$0xff]  ;;  %v462_v1 = vld [vmem:[#allocation3 + $0x18] sm:$0x3f]  ;;  %vm173_vm1 = vcmask 1044480  }
  0x27   :  { %v74_v2 = vmul.f32 0.5, %v460_v0  ;;  %v465_v3 = vld [vmem:[#allocation6 + $0x10] sm:$0xff]  ;;  %v467_v4 = vld [vmem:[#allocation6 + $0x18] sm:$0x3f]  ;;  %v79_v5 = vmul.f32 0.5, %v462_v1  ;;  %vm260_vm6 = vcmask 1041408  }
  0x28   :  { %v55_v6 = vmul.f32 0.5, %v465_v3  ;;  %v60_v7 = vmul.f32 0.5, %v467_v4  ;;  %v474_v10 = vsub.f32 %v460_v0, %v465_v3  ;;  %v54_v51 = vsub.f32 1.0, %v465_v3  ;;  %s399_s8 = scalar_lea.hbm %s526_s2, 16 }
  0x29   :  { %v76_v8 = vrot.slane %v74_v2, 2  ;;  %v81_v9 = vrot.slane %v79_v5, 2  ;;  %v244_v61 = vrot.slane %v465_v3, 3  ;;  %vm292_vm9 = vcmask 1043456   ;;  %p400_p2 = scmp.ne.s32.totalorder %s526_s2, %s399_s8  ;;  %p403_p3 = scmp.lt.u32.totalorder %s399_s8, %s526_s2 }
  0x2a   :  { %v57_v11 = vrot.slane %v55_v6, 2  ;;  %v62_v12 = vrot.slane %v60_v7, 2  ;;  %v243_v60 = vmul.f32 %v474_v10, %v54_v51  ;;  %vm306_vm12 = vcmask 1040384  }
  0x2b   :  { %v78_v13 = vsub.f32 %v460_v0, %v76_v8  ;;  %v84_v14 = vadd.f32 %v76_v8, %v460_v0  ;;  %v83_v15 = vsub.f32 %v460_v0, %v81_v9  ;;  %v85_v16 = vadd.f32 %v81_v9, %v460_v0  ;;  %p405_p4 = pnand %p403_p3, %p400_p2 }
  0x2c   :  { %v108_v17 = vsub.f32 %v462_v1, %v81_v9  ;;  %v109_v18 = vadd.f32 %v81_v9, %v462_v1  ;;  %v59_v19 = vsub.f32 %v465_v3, %v57_v11  ;;  %v64_v20 = vsub.f32 %v465_v3, %v62_v12 }
  0x2d   :  { %v65_v21 = vadd.f32 %v57_v11, %v465_v3  ;;  %v66_v22 = vadd.f32 %v62_v12, %v465_v3  ;;  %v86_v23 = vsub.f32 %v84_v14, %v78_v13  ;;  %v87_v24 = vsub.f32 %v85_v16, %v83_v15 }
  0x2e   :  { %v110_v25 = vsub.f32 %v109_v18, %v108_v17  ;;  %v94_v29 = vmax.f32 %v78_v13, %v59_v19  ;;  %v98_v32 = vmax.f32 %v83_v15, %v64_v20  ;;  %v121_v37 = vrot.slane %v59_v19, 3 }
  0x2f   :  { %v67_v26 = vsub.f32 %v65_v21, %v59_v19  ;;  %v68_v27 = vsub.f32 %v66_v22, %v64_v20  ;;  %v93_v28 = vmin.f32 %v84_v14, %v65_v21  ;;  %v89_v30 = vrot.slane %v87_v24, 1 }
  0x30   :  { %v97_v31 = vmin.f32 %v85_v16, %v66_v22  ;;  %v112_v33 = vrot.slane %v110_v25, 1  ;;  %v117_v36 = vrot.slane %v65_v21, 3  ;;  %v127_v40 = vrot.slane %v66_v22, 3 }
  0x31   :  { %v70_v34 = vrot.slane %v68_v27, 1  ;;  %v95_v35 = vsub.f32 %v93_v28, %v94_v29  ;;  %v91_v38 = vmul.f32 %v89_v30, %v86_v23  ;;  %v123_v43 = vmax.f32 %v108_v17, %v121_v37 }
  0x32   :  { %v99_v39 = vsub.f32 %v97_v31, %v98_v32  ;;  %v119_v42 = vmin.f32 %v109_v18, %v117_v36  ;;  %v114_v48 = vmul.f32 %v112_v33, %v110_v25  ;;  %v129_v49 = vmin.f32 %v109_v18, %v127_v40 }
  0x33   :  { %v72_v41 = vmul.f32 %v70_v34, %v67_v26  ;;  %v92_v44 = vand.u32 2147483647, %v91_v38  ;;  %v96_v45 = vmax.f32 %v95_v35, 0.0  ;;  %v131_v50 = vrot.slane %v64_v20, 3 }
  0x34   :  { %v100_v46 = vmax.f32 %v99_v39, 0.0  ;;  %v124_v54 = vsub.f32 %v119_v42, %v123_v43  ;;  %v115_v57 = vand.u32 2147483647, %v114_v48  ;;  %v246_v5 = vsub.f32 %v462_v1, %v244_v61 }
  0x35   :  { %v73_v47 = vand.u32 2147483647, %v72_v41  ;;  %v133_v55 = vmax.f32 %v108_v17, %v131_v50  ;;  %v283_v13 = vmul.f32 %v243_v60, %v243_v60  ;;  %v160_v15 = vlaneseq }
  0x36   :  { %v102_v52 = vrot.slane %v100_v46, 1  ;;  %v125_v63 = vmax.f32 %v124_v54, 0.0  ;;  %v248_v8 = vrot.slane %v246_v5, 5  ;;  %v226_v26 = vrot.slane %v462_v1, 7 }
  0x37   :  { %v105_v53 = vadd.f32 %v92_v44, %v73_v47  ;;  %v134_v58 = vsub.f32 %v129_v49, %v133_v55  ;;  %v141_v59 = vrot.slane %v73_v47, 3  ;;  %v161_v21 = vshrl.u32 %v160_v15, 7  ;;  %v47_v55 = vld [vmem:[#allocation3 + $0x8] sm:$0xff] }
  0x38   :  { %v104_v56 = vmul.f32 %v102_v52, %v96_v45  ;;  %v250_v12 = vmul.f32 %v248_v8, %v54_v51  ;;  %v230_v28 = vrot.slane %v460_v0, 2  ;;  %v419_v29 = vmov 0.0  }
  0x39   :  { %v135_v2 = vmax.f32 %v134_v58, 0.0  ;;  %v143_v7 = vadd.f32 %v141_v59, %v115_v57  ;;  %v181_v24 = vsub.s32 4, %v161_v21  ;;  %v162_v27 = vsub.s32 2, %v161_v21  ;;  %v51_v57 = vld [vmem:[#allocation6 + $0x8] sm:$0xff] }
  0x3a   :  { %v106_v62 = vsub.f32 %v105_v53, %v104_v56  ;;  %v284_v16 = vmul.f32 %v250_v12, %v250_v12  ;;  %v235_v39 = vrot.slane %v465_v3, 2  ;;  %v46_v53 = vld [vmem:[#allocation3] sm:$0xff] }
  0x3b   :  { %v137_v6 = vrot.slane %v135_v2, 1  ;;  %v182_v31 = vrot.slane %v465_v3, %v181_v24 }
  0x3c   :  { %v107_v9 = vadd.f32 1e-06, %v106_v62  ;;  %v490_v19 = vadd.f32 %v284_v16, %v283_v13  ;;  %v252_v62 = vsub.f32 %v47_v55, %v51_v57 }
  0x3d   :  { %v139_v11 = vmul.f32 %v137_v6, %v125_v63  ;;  %v184_v35 = vmul.f32 %v182_v31, %v465_v3  ;;  %v185_v37 = vmul.f32 %v182_v31, %v467_v4 }
  0x3e   :  { %v147_v18 = vrot.slane %v107_v9, 3  ;;  %v254_v8 = vmul.f32 %v252_v62, %v182_v31  ;;  %v255_v9 = vmul.f32 %v474_v10, %v182_v31 }
  0x3f   :  { %v144_v14 = vsub.f32 %v143_v7, %v139_v11  ;;  %349 = vrsqrt.f32 %v184_v35  ;;  %vm206_vm2 = vcmp.eq.f32.partialorder %v184_v35, inf  ;;  %vm213_vm3 = vcmp.eq.f32.partialorder %v185_v37, inf }
  0x40   :  { %v149_v22 = vmul.f32 %v147_v18, %v139_v11  ;;  %351 = vrsqrt.f32 %v185_v37  ;;  %vm208_vm4 = vcmp.eq.f32.partialorder %v184_v35, 0.0  ;;  %v209_v63 = vand.u32 2147483648, %v184_v35 }
  0x41   :  { %v145_v17 = vadd.f32 1e-06, %v144_v14  ;;  %vm215_vm5 = vcmp.eq.f32.partialorder %v185_v37, 0.0  ;;  %v216_v2 = vand.u32 2147483648, %v185_v37  ;;  %v290_v21 = vmul.f32 %v255_v9, %v255_v9 }
  0x43   :  { %v151_v20 = vrot.slane %v145_v17, 5  ;;  %v289_v17 = vmul.f32 %v254_v8, %v254_v8 }
  0x45   :  { %v153_v23 = vmul.f32 %v151_v20, %v104_v56  ;;  %v50_v56 = vld [vmem:[#allocation6] sm:$0xff] }
  0x46   :  { %v251_v61 = vsub.f32 %v46_v53, %v50_v56 }
  0x47   :  { %v155_v25 = vrot.slane %v153_v23, 3 }
  0x48   :  { %v253_v7 = vmul.f32 %v251_v61, %v182_v31 }
  0x49   :  { %vm157_vm0 = vcmp.gt.f32.partialorder %v149_v22, %v155_v25  ;;  %v350_v52 = vpop.eup %349 }
  0x4a   :  { %v158_v30 = vsel %vm157_vm0, 1.0, %v419_v29  ;;  %v205_v59 = vmul.f32 %v350_v52, %v184_v35  ;;  %v288_v16 = vmul.f32 %v253_v7, %v253_v7 }
  0x4b   :  { %v159_v32 = vsub.f32 1.0, %v158_v30  ;;  %v228_v33 = vmul.f32 %v226_v26, %v158_v30  ;;  %v163_v34 = vrot.slane %v158_v30, %v162_v27 }
  0x4c   :  { %v207_v5 = vsel %vm206_vm2, %v184_v35, %v205_v59  ;;  %v291_v26 = vadd.f32 %v289_v17, %v288_v16 }
  0x4d   :  { %v168_v36 = vrot.slane %v159_v32, %v162_v27  ;;  %v232_v38 = vmul.f32 %v230_v28, %v159_v32  ;;  %v164_v43 = vmul.f32 %v163_v34, %v462_v1  ;;  %v210_v12 = vsel %vm208_vm4, %v209_v63, %v207_v5 }
  0x4e   :  { %v220_v22 = vrot.slane %v210_v12, 3  ;;  %v293_v28 = vsel %vm292_vm9, %v290_v21, 0.0 }
  0x4f   :  { %v169_v40 = vmul.f32 %v168_v36, %v460_v0  ;;  %v170_v41 = vmul.f32 %v168_v36, %v462_v1  ;;  %v233_v42 = vadd.f32 %v232_v38, %v228_v33  ;;  %v187_v0 = vrot.slane %v184_v35, 3  ;;  %v352_v1 = vpop.eup %351 }
  0x50   :  { %v212_v60 = vmul.f32 %v352_v1, %v185_v37  ;;  %v294_v33 = vadd.f32 %v293_v28, %v291_v26  ;;  %v286_v1 = vmul.f32 0.5, %v490_v19 }
  0x51   :  { %v174_v44 = vrot.slane %v169_v40, 3  ;;  %v175_v45 = vrot.slane %v170_v41, 3  ;;  %v237_v46 = vsub.f32 %v233_v42, %v235_v39 }
  0x52   :  { %v214_v6 = vsel %vm213_vm3, %v185_v37, %v212_v60  ;;  %v295_v37 = vrot.slane %v294_v33, 4 }
  0x53   :  { %v176_v47 = vsel %vm173_vm1, %v174_v44, %v175_v45  ;;  %v239_v48 = vrot.slane %v237_v46, 6  ;;  %v217_v13 = vsel %vm215_vm5, %v216_v2, %v214_v6 }
  0x54   :  { %v178_v4 = vadd.f32 %v176_v47, %v164_v43  ;;  %v221_v23 = vrot.slane %v217_v13, 3  ;;  %v296_v42 = vadd.f32 %v295_v37, %v294_v33 }
  0x55   :  { %v503_v49 = vmul.f32 %v239_v48, %v465_v3 }
  0x56   :  { %v183_v50 = vmul.f32 %v182_v31, %v178_v4  ;;  %v222_v29 = vsel %vm173_vm1, %v220_v22, %v221_v23  ;;  %v297_v46 = vrot.slane %v296_v42, 2 }
  0x57   :  { %v281_v52 = vmul.f32 %v503_v49, %v503_v49 }
  0x58   :  { %v190_v51 = vadd.f32 1e-06, %v183_v50  ;;  %v189_v58 = vsub.f32 %v183_v50, %v187_v0  ;;  %vm200_vm10 = vcmp.lt.f32.partialorder %v183_v50, 0.0  ;;  %vm199_vm11 = vcmp.gt.f32.partialorder %v183_v50, 0.0 }
  0x59   :  { %v298_v50 = vadd.f32 %v297_v46, %v296_v42 }
  0x5a   :  { %v191_v54 = vand.u32 2147483647, %v190_v51  ;;  %v256_v3 = vmul.f32 %v189_v58, %v189_v58 }
  0x5b   :  { %v299_v53 = vrot.slane %v298_v50, 1 }
  0x5c   :  { %353 = vrsqrt.f32 %v191_v54  ;;  %v258_v11 = vrot.slane %v256_v3, 2  ;;  %vm194_vm7 = vcmp.eq.f32.partialorder %v191_v54, inf  ;;  %v197_v15 = vand.u32 2147483648, %v191_v54 }
  0x5d   :  { %vm196_vm8 = vcmp.eq.f32.partialorder %v191_v54, 0.0  ;;  %v300_v56 = vadd.f32 %v299_v53, %v298_v50 }
  0x5e   :  { %v261_v20 = vsel %vm260_vm6, %v258_v11, 0.0 }
  0x5f   :  { %v262_v10 = vrot.slane %v261_v20, 4 }
  0x61   :  { %v263_v32 = vadd.f32 %v262_v10, %v261_v20 }
  0x63   :  { %v264_v36 = vrot.slane %v263_v32, 2 }
  0x65   :  { %v265_v40 = vadd.f32 %v264_v36, %v263_v32 }
  0x66   :  { %v354_v14 = vpop.eup %353 }
  0x67   :  { %v193_v18 = vmul.f32 %v354_v14, %v191_v54  ;;  %v266_v44 = vrot.slane %v265_v40, 1 }
  0x69   :  { %v195_v24 = vsel %vm194_vm7, %v191_v54, %v193_v18  ;;  %v267_v48 = vadd.f32 %v266_v44, %v265_v40 }
  0x6a   :  { %v198_v25 = vsel %vm196_vm8, %v197_v15, %v195_v24 }
  0x6b   :  { %v201_v27 = vsub.f32 0.0, %v198_v25 }
  0x6d   :  { %v202_v30 = vsel %vm200_vm10, %v201_v27, 0.0 }
  0x6e   :  { %v203_v31 = vsel %vm199_vm11, %v198_v25, %v202_v30 }
  0x6f   :  { %v224_v34 = vsub.f32 %v203_v31, %v222_v29 }
  0x71   :  { %v268_v35 = vmul.f32 %v224_v34, %v224_v34 }
  0x73   :  { %v270_v38 = vrot.slane %v268_v35, 4 }
  0x75   :  { %v272_v39 = vsel %vm260_vm6, %v270_v38, 0.0 }
  0x76   :  { %v273_v41 = vrot.slane %v272_v39, 4 }
  0x78   :  { %v274_v43 = vadd.f32 %v273_v41, %v272_v39 }
  0x7a   :  { %v275_v45 = vrot.slane %v274_v43, 2 }
  0x7c   :  { %v276_v47 = vadd.f32 %v275_v45, %v274_v43 }
  0x7e   :  { %v277_v4 = vrot.slane %v276_v47, 1 }
  0x80   :  { %v278_v0 = vadd.f32 %v277_v4, %v276_v47 }
  0x82   :  { %v279_v51 = vadd.f32 %v278_v0, %v267_v48 }
  0x84   :  { %v280_v54 = vmul.f32 5.0, %v279_v51 }
  0x86   :  { %v282_v55 = vadd.f32 %v281_v52, %v280_v54 }
  0x88   :  { %v287_v57 = vadd.f32 %v286_v1, %v282_v55 }
  0x8a   :  { %v301_v58 = vadd.f32 %v300_v56, %v287_v57 }
  0x8c   :  { %v304_v59 = vrot.slane %v301_v58, 4 }
  0x8e   :  { %v307_v60 = vsel %vm306_vm12, %v304_v59, 0.0 }
  0x8f   :  { %308 = vadd.xlane.f32.xlu0 %v307_v60 }
 0x11c   :  { %v309_v61 = vpop.xlane.xlu0 %308 }
 0x11d   :  { %v310_v62 = vrot.slane %v309_v61, 4 }
 0x11f   :  { %v311_v3 = vadd.f32 %v310_v62, %v309_v61 }
 0x121   :  { %v312_v63 = vrot.slane %v311_v3, 2 }
 0x123   :  { %v313_v2 = vadd.f32 %v312_v63, %v311_v3 }
 0x125   :  { %v314_v5 = vrot.slane %v313_v2, 1 }
 0x127   :  { %v315_v6 = vadd.f32 %v314_v5, %v313_v2 }
 0x129   :  { %341 = vpush %v315_v6 }
 0x15a   :  { %s342_s1 = spop %341 }
 0x15b   :  { %325 = sst [smem:[#allocation8]] %s342_s1 }
 0x15c   :  { %408 = shalt.err (!%p405_p4)
}
 0x15d   :  { %s420_s13 = smov [#allocation8]  }
 0x15e   :  { %333 = dma.smem_to_hbm %s420_s13, 16, %s526_s2, [#allocation5]  }
 0x15f   :  { %413 = dma.done.wait [#allocation5], 16  }
 0x160   :  { %414 = vsyncadd [#allocation5], 4294967280 }
 0x161   :  { %337 = sfence }
 0x162   :  { %338 = vsyncpa [#allocation4], 1 }
 0x163   :  { %339 = vsyncpa [#allocation7], 1 }
 0x164   :  { %340 = vsyncpa [#allocation5], 1 }

</bundles_post_ra>
